<compile_context>
chip_gen: v7x
topology: tpu7x:2x2x1
jax: 0.10.0
libtpu: 0.0.40
codegen_flags: <defaults>
</compile_context>

<pallas_src>
import functools

import jax
import jax.numpy as jnp
from jax.experimental import pallas as pl
from jax.experimental.pallas import tpu as pltpu

_NEG = -1e30   # finite mask sentinel (avoids inf-inf NaN in the online softmax)


def _round_up(a, b):
    return (a + b - 1) // b * b


def _device_config():
    """Per-TPU-generation tile sizes, score dtype, VMEM limit, adj buffering."""
    try:
        kind = jax.devices()[0].device_kind.lower()
    except Exception:
        kind = ""
    if "v5" in kind:
        # 128 MiB VMEM, no packed-bf16 VALU/EUP, lowest HBM BW -> f32 scores,
        # deeper adj buffering to hide exposed DMA.
        return dict(vmem=100 * 2**20, td=1024, ts=2048,
                    score=jnp.float32, adj_bufs=3)
    if "v6" in kind:
        return dict(vmem=100 * 2**20, td=1024, ts=2048,
                    score=jnp.bfloat16, adj_bufs=2)
    if "v7" in kind:
        # 64 MiB VMEM per TC; smaller tiles also keep >=2 dst tiles for 2 TCs.
        return dict(vmem=44 * 2**20, td=512, ts=1024,
                    score=jnp.bfloat16, adj_bufs=2)
    return dict(vmem=44 * 2**20, td=512, ts=1024,
                score=jnp.float32, adj_bufs=2)


def _pick_tiles(n, hc, cfg):
    """Choose (n_pad, tile_dst, tile_src) fitting the per-generation VMEM budget."""
    if n <= 1024:
        n_pad = _round_up(n, 8)
        return n_pad, n_pad, n_pad
    td, ts = cfg["td"], cfg["ts"]
    item = jnp.dtype(cfg["score"]).itemsize
    while td > 256:
        est = (3 * td * ts * item            # e/p score temporaries
               + cfg["adj_bufs"] * td * ts   # int8 adjacency tiles
               + 2 * ts * hc * 2             # projected-h tiles (bf16, 2 bufs)
               + 3 * td * hc * 4)            # acc scratch + output slack (f32)
        if est <= int(cfg["vmem"] * 0.7):
            break
        if ts > td:
            ts //= 2
        else:
            td //= 2
    n_pad = _round_up(n, max(td, ts))
    return n_pad, td, ts


def _pack_att(att, heads, c):
    """att [H, C] -> block-diagonal [H*C, H] so ONE MXU matmul h @ pack gives
    all per-head attention logits (no per-head XLU reductions)."""
    m = jnp.zeros((heads * c, heads), jnp.float32)
    for hh in range(heads):
        m = m.at[hh * c:(hh + 1) * c, hh].set(att[hh])
    return m.astype(jnp.bfloat16)


# --------------------------------------------------------------------------
# Kernel A: feature projection + batched attention logits
#   h      = x @ W                                (bf16 MXU, f32 acc)
#   scores = h @ [blockdiag(a_src) | blockdiag(a_dst)]   [N, 2H]
# --------------------------------------------------------------------------
def _project_kernel(x_ref, w_ref, a_ref, h_ref, s_ref):
    x = x_ref[...].astype(jnp.bfloat16)
    h = jnp.dot(x, w_ref[...], preferred_element_type=jnp.float32)
    h_bf = h.astype(jnp.bfloat16)
    h_ref[...] = h_bf
    s_ref[...] = jnp.dot(h_bf, a_ref[...], preferred_element_type=jnp.float32)


def gat_project(x_bf, w_bf, a_pack, *, tile_n, vmem_limit):
    n_pad, fin = x_bf.shape
    hc = w_bf.shape[1]
    ncols = a_pack.shape[1]
    return pl.pallas_call(
        _project_kernel,
        grid=(n_pad // tile_n,),
        in_specs=[
            pl.BlockSpec((tile_n, fin), lambda i: (i, 0)),
            pl.BlockSpec((fin, hc), lambda i: (0, 0)),
            pl.BlockSpec((hc, ncols), lambda i: (0, 0)),
        ],
        out_specs=[
            pl.BlockSpec((tile_n, hc), lambda i: (i, 0)),
            pl.BlockSpec((tile_n, ncols), lambda i: (i, 0)),
        ],
        out_shape=[
            jax.ShapeDtypeStruct((n_pad, hc), jnp.bfloat16),
            jax.ShapeDtypeStruct((n_pad, ncols), jnp.float32),
        ],
        compiler_params=pltpu.CompilerParams(
            dimension_semantics=("parallel",),
            vmem_limit_bytes=vmem_limit),
    )(x_bf, w_bf, a_pack)


# --------------------------------------------------------------------------
# Kernel B: masked attention softmax + aggregation (flash-style over src axis)
# grid = (dst tiles [parallel], src tiles [arbitrary/reduction]).
# mode="proj": fuse next GATConv projection into the finalize epilogue.
# mode="lin" : fuse final Linear + Sigmoid into the finalize epilogue.
# --------------------------------------------------------------------------
def _attn_kernel(bm_ref, asrc_t_ref, adst_ref, h_ref, adj_ref, bias_ref, *rest,
                 heads, out_ch, concat, mode, score_dtype):
    if mode == "proj":
        wn_ref, an_ref, hn_ref, sn_ref, m_ref, l_ref, acc_ref = rest
    else:  # "lin"
        wl_ref, bl_ref, out_ref, m_ref, l_ref, acc_ref = rest

    i = pl.program_id(0)
    k = pl.program_id(1)

    @pl.when(k == 0)
    def _init():
        m_ref[...] = jnp.full(m_ref.shape, _NEG, jnp.float32)
        l_ref[...] = jnp.zeros_like(l_ref)
        acc_ref[...] = jnp.zeros_like(acc_ref)

    # Block-sparsity: skip the whole score/softmax/aggregation body when the
    # (dst, src) adjacency block contains no edges (SMEM-prefetched bitmap).
    # TODO(synk): also remap index_maps so the adj/h DMAs are skipped for empty
    # blocks (currently only the compute is skipped).
    @pl.when(bm_ref[i, k] != 0)
    def _compute():
        adj = adj_ref[...]                           # [TD, TS] int8 (0/1)
        valid = adj != 0
        a_dst = adst_ref[...].astype(score_dtype)    # [TD, H]
        a_src = asrc_t_ref[...].astype(score_dtype)  # [H, TS] (pre-transposed)
        h_blk = h_ref[...]                           # [TS, H*C] bf16
        ones_col = jnp.ones((h_blk.shape[0], 1), jnp.bfloat16)

        for hh in range(heads):                      # heads is a static int
            # e[i, j] = a_dst[i] + a_src[j]; LeakyReLU(0.2); mask.
            e = a_dst[:, hh:hh + 1] + a_src[hh:hh + 1, :]          # [TD, TS]
            e = jnp.maximum(e, e * 0.2)                            # LeakyReLU
            e = jnp.where(valid, e, _NEG)
            m_prev = m_ref[:, hh:hh + 1]                           # f32
            m_new = jnp.maximum(
                m_prev, jnp.max(e, axis=1, keepdims=True).astype(jnp.float32))
            corr = jnp.exp(m_prev - m_new)                         # f32 rescale
            p = jnp.exp(e - m_new.astype(score_dtype))
            p = jnp.where(valid, p, 0.0)             # robust (sentinel-free) mask
            p_bf = p.astype(jnp.bfloat16)
            hv = h_blk[:, hh * out_ch:(hh + 1) * out_ch]           # [TS, C]
            pv = jnp.dot(p_bf, hv, preferred_element_type=jnp.float32)
            # Row-sum of p on the MXU (extra LHS pass, MXU is far from saturated)
            # instead of an XLU cross-lane reduce.
            ps = jnp.dot(p_bf, ones_col, preferred_element_type=jnp.float32)
            acc_ref[:, hh * out_ch:(hh + 1) * out_ch] = (
                corr * acc_ref[:, hh * out_ch:(hh + 1) * out_ch] + pv)
            l_ref[:, hh:hh + 1] = corr * l_ref[:, hh:hh + 1] + ps
            m_ref[:, hh:hh + 1] = m_new
            # TODO(synk): lane-dense layout for m/l scratch (the per-head column
            # stores above are narrow masked vst; ~5-10% of the VALU bottleneck).

    @pl.when(k == pl.num_programs(1) - 1)
    def _finalize():
        inv_l = pl.reciprocal(l_ref[...], approx=True)             # EUP slot
        acc = acc_ref[...]
        outs = [acc[:, hh * out_ch:(hh + 1) * out_ch] * inv_l[:, hh:hh + 1]
                for hh in range(heads)]
        if concat:
            out = jnp.concatenate(outs, axis=1) if heads > 1 else outs[0]
        else:
            out = outs[0]
            for o in outs[1:]:
                out = out + o
            out = out * (1.0 / heads)
        out = out + bias_ref[...]
        # ELU with clamped exp argument (no inf in the untaken branch).
        out = jnp.where(out > 0, out, jnp.exp(jnp.minimum(out, 0.0)) - 1.0)
        out_bf = out.astype(jnp.bfloat16)
        if mode == "proj":
            # Fused next-layer projection: h2 = ELU(out) @ W2, s2 = h2 @ [a_s|a_d].
            hn = jnp.dot(out_bf, wn_ref[...], preferred_element_type=jnp.float32)
            hn_bf = hn.astype(jnp.bfloat16)
            hn_ref[...] = hn_bf
            sn_ref[...] = jnp.dot(hn_bf, an_ref[...],
                                  preferred_element_type=jnp.float32)
        else:
            y = jnp.dot(out_bf, wl_ref[...],
                        preferred_element_type=jnp.float32) + bl_ref[...]
            out_ref[...] = (1.0 / (1.0 + jnp.exp(-y))).astype(out_ref.dtype)


def _adj_spec(tile_dst, tile_src, buffers):
    idx = lambda i, k, bm: (i, k)
    if buffers > 2:
        try:   # deeper buffering hides exposed adj DMA on low-BW parts (v5e)
            return pl.BlockSpec((tile_dst, tile_src), idx,
                                pipeline_mode=pl.Buffered(buffers))
        except Exception:
            pass
    return pl.BlockSpec((tile_dst, tile_src), idx)


def gat_attention(bitmap, asrc_t, adst, h, adj, bias, *, heads, out_ch, concat,
                  mode, extra, tile_dst, tile_src, cfg):
    n_pad = adj.shape[0]
    hc = heads * out_ch
    conv_dim = hc if concat else out_ch
    grid = (n_pad // tile_dst, n_pad // tile_src)
    adj_bufs = cfg["adj_bufs"] if grid[1] > cfg["adj_bufs"] else 2

    idx_dst = lambda i, k, bm: (i, 0)
    idx_src_t = lambda i, k, bm: (0, k)
    idx_h = lambda i, k, bm: (k, 0)
    idx_full = lambda i, k, bm: (0, 0)

    in_specs = [
        pl.BlockSpec((heads, tile_src), idx_src_t),       # a_src^T
        pl.BlockSpec((tile_dst, heads), idx_dst),         # a_dst
        pl.BlockSpec((tile_src, hc), idx_h),              # projected h (bf16)
        _adj_spec(tile_dst, tile_src, adj_bufs),          # adjacency tile (int8)
        pl.BlockSpec((1, conv_dim), idx_full),            # conv bias
    ]
    args = [asrc_t, adst, h, adj, bias]

    if mode == "proj":
        w_next, a_next = extra
        c_next = w_next.shape[1]
        in_specs += [pl.BlockSpec(w_next.shape, idx_full),
                     pl.BlockSpec(a_next.shape, idx_full)]
        args += [w_next, a_next]
        out_specs = [pl.BlockSpec((tile_dst, c_next), idx_dst),
                     pl.BlockSpec((tile_dst, 2), idx_dst)]
        out_shape = [jax.ShapeDtypeStruct((n_pad, c_next), jnp.bfloat16),
                     jax.ShapeDtypeStruct((n_pad, 2), jnp.float32)]
    else:
        w_lin, b_lin = extra
        out_dim = w_lin.shape[1]
        in_specs += [pl.BlockSpec(w_lin.shape, idx_full),
                     pl.BlockSpec((1, out_dim), idx_full)]
        args += [w_lin, b_lin]
        out_specs = pl.BlockSpec((tile_dst, out_dim), idx_dst)
        out_shape = jax.ShapeDtypeStruct((n_pad, out_dim), jnp.float32)

    kernel = functools.partial(_attn_kernel, heads=heads, out_ch=out_ch,
                               concat=concat, mode=mode,
                               score_dtype=cfg["score"])
    return pl.pallas_call(
        kernel,
        grid_spec=pltpu.PrefetchScalarGridSpec(
            num_scalar_prefetch=1,
            grid=grid,
            in_specs=in_specs,
            out_specs=out_specs,
            scratch_shapes=[
                pltpu.VMEM((tile_dst, heads), jnp.float32),   # running max
                pltpu.VMEM((tile_dst, heads), jnp.float32),   # running sum
                pltpu.VMEM((tile_dst, hc), jnp.float32),      # running weighted acc
            ]),
        out_shape=out_shape,
        compiler_params=pltpu.CompilerParams(
            dimension_semantics=("parallel", "arbitrary"),
            vmem_limit_bytes=cfg["vmem"]),
    )(bitmap, *args)


# --------------------------------------------------------------------------
# Full GAT forward (3 pallas_calls total)
# --------------------------------------------------------------------------
def gat_forward(params, x, edge_index, edge_attr, *, heads, hidden):
    del edge_attr   # GATConv built without edge_dim -> ignored (API parity)
    n, fin = x.shape
    c2 = hidden // 4
    hc = heads * hidden

    cfg = _device_config()
    n_pad, tile_dst, tile_src = _pick_tiles(n, hc, cfg)
    ntd, nts = n_pad // tile_dst, n_pad // tile_src

    src, dst = edge_index[0], edge_index[1]

    # int8 adjacency (mask only, never fed to the MXU), built directly in the
    # target dtype with scattered self-loops: no O(N^2) f32 eye/maximum/cast.
    idx = jnp.arange(n_pad)
    adj = (jnp.zeros((n_pad, n_pad), jnp.int8)
           .at[dst, src].set(1)
           .at[idx, idx].set(1))
    # TODO(synk): replace the dense adjacency with CSR + in-kernel mask
    # generation (PrefetchScalarGridSpec row offsets) for very large graphs.

    # Block-occupancy bitmap, O(E + n_tiles) construction (SMEM scalar prefetch).
    bi = jnp.arange(ntd)
    bitmap = (jnp.zeros((ntd, nts), jnp.int32)
              .at[dst // tile_dst, src // tile_src].set(1)
              .at[bi, (bi * tile_dst) // tile_src].set(1))    # self-loop blocks

    xp = jnp.zeros((n_pad, fin), jnp.bfloat16).at[:n].set(x.astype(jnp.bfloat16))

    # ---- conv1 projection: h1 = x @ W1, scores1 = h1 @ [bd(a_src) | bd(a_dst)]
    w1 = params['w1'].astype(jnp.bfloat16)
    a1 = jnp.concatenate([_pack_att(params['att_src1'], heads, hidden),
                          _pack_att(params['att_dst1'], heads, hidden)], axis=1)
    h1, scores1 = gat_project(xp, w1, a1, tile_n=tile_dst, vmem_limit=cfg["vmem"])
    s_src1_t = scores1[:, :heads].T            # [H, N]  (tiny host transpose)
    s_dst1 = scores1[:, heads:]                # [N, H]

    # ---- conv1 attention (+ELU) with conv2's projection fused in the epilogue;
    # the [N, H*hidden] conv1 output never round-trips HBM.
    w2 = params['w2'].astype(jnp.bfloat16)
    a2 = jnp.concatenate([_pack_att(params['att_src2'], 1, c2),
                          _pack_att(params['att_dst2'], 1, c2)], axis=1)
    h2, s2 = gat_attention(
        bitmap, s_src1_t, s_dst1, h1, adj, params['b1'],
        heads=heads, out_ch=hidden, concat=True,
        mode="proj", extra=(w2, a2),
        tile_dst=tile_dst, tile_src=tile_src, cfg=cfg)
    s_src2_t = s2[:, 0:1].T                    # [1, N]
    s_dst2 = s2[:, 1:2]                        # [N, 1]

    # ---- conv2 attention (+ELU) with Linear + Sigmoid fused in the epilogue.
    y = gat_attention(
        bitmap, s_src2_t, s_dst2, h2, adj, params['b2'],
        heads=1, out_ch=c2, concat=False,
        mode="lin", extra=(params['w_lin'].astype(jnp.bfloat16), params['b_lin']),
        tile_dst=tile_dst, tile_src=tile_src, cfg=cfg)
    return y[:n]


def init_params(key, in_ch, hidden, out_ch, heads):
    ks = jax.random.split(key, 8)
    c2 = hidden // 4
    scale = 0.2
    return {
        'w1': scale * jax.random.normal(ks[0], (in_ch, heads * hidden), jnp.float32),
        'att_src1': scale * jax.random.normal(ks[1], (heads, hidden), jnp.float32),
        'att_dst1': scale * jax.random.normal(ks[2], (heads, hidden), jnp.float32),
        'b1': jnp.zeros((1, heads * hidden), jnp.float32),
        'w2': scale * jax.random.normal(ks[3], (heads * hidden, c2), jnp.float32),
        'att_src2': scale * jax.random.normal(ks[4], (1, c2), jnp.float32),
        'att_dst2': scale * jax.random.normal(ks[5], (1, c2), jnp.float32),
        'b2': jnp.zeros((1, c2), jnp.float32),
        'w_lin': scale * jax.random.normal(ks[6], (c2, out_ch), jnp.float32),
        'b_lin': scale * jax.random.normal(ks[7], (1, out_ch), jnp.float32),
    }


# Pure-JAX reference (f32) for the correctness check.
def gat_reference(params, x, edge_index, *, heads, hidden):
    n = x.shape[0]
    src, dst = edge_index[0], edge_index[1]
    adj = jnp.zeros((n, n), jnp.float32).at[dst, src].set(1.0)
    adj = jnp.maximum(adj, jnp.eye(n, dtype=jnp.float32))

    def conv(xx, w, att_s, att_d, b, nh, c, concat):
        h = xx @ w
        outs = []
        for hh in range(nh):
            hf = h[:, hh * c:(hh + 1) * c]
            asrc = hf @ att_s[hh]
            adst = hf @ att_d[hh]
            e = adst[:, None] + asrc[None, :]
            e = jnp.where(e > 0, e, 0.2 * e)
            e = jnp.where(adj > 0, e, -jnp.inf)
            alpha = jax.nn.softmax(e, axis=1)
            outs.append(alpha @ hf)
        out = jnp.concatenate(outs, 1) if concat else sum(outs) / nh
        return out + b

    h = jax.nn.elu(conv(x, params['w1'], params['att_src1'],
                        params['att_dst1'], params['b1'], heads, hidden, True))
    h = jax.nn.elu(conv(h, params['w2'], params['att_src2'],
                        params['att_dst2'], params['b2'], 1, hidden // 4, False))
    return jax.nn.sigmoid(h @ params['w_lin'] + params['b_lin'])


if __name__ == "__main__":
    N, IN_CH, HIDDEN, HEADS, OUT_CH, E = 8, 8, 8, 2, 4, 16

    key = jax.random.PRNGKey(0)
    k_x, k_src, k_dst, k_ea, k_p = jax.random.split(key, 5)

    x = jax.random.normal(k_x, (N, IN_CH), jnp.float32)
    src = jax.random.randint(k_src, (E,), 0, N)
    dst = jax.random.randint(k_dst, (E,), 0, N)
    edge_index = jnp.stack([src, dst])                        # [2, E], PyG convention
    edge_attr = jax.random.normal(k_ea, (E, 3), jnp.float32)  # ignored (edge_dim=None)

    params = init_params(k_p, IN_CH, HIDDEN, OUT_CH, HEADS)

    out = gat_forward(params, x, edge_index, edge_attr, heads=HEADS, hidden=HIDDEN)
    out = jax.block_until_ready(out)

    assert out.shape == (N, OUT_CH), out.shape
    assert bool(jnp.all(jnp.isfinite(out)))
    assert bool(jnp.all((out >= 0.0) & (out <= 1.0)))         # sigmoid range

    ref = gat_reference(params, x, edge_index, heads=HEADS, hidden=HIDDEN)
    assert bool(jnp.allclose(out, ref, atol=6e-2, rtol=6e-2)), (
        "max abs err", float(jnp.max(jnp.abs(out - ref))))

    print("KERNEL_OK")
</pallas_src>

<mosaic_0001>
module attributes {stable_mosaic.version = 11 : i64} {
  func.func @_project_kernel(%arg0: i32, %arg1: memref<8x8xbf16, #tpu.memory_space<vmem>>, %arg2: memref<8x16xbf16, #tpu.memory_space<vmem>>, %arg3: memref<16x4xbf16, #tpu.memory_space<vmem>>, %arg4: memref<8x16xbf16, #tpu.memory_space<vmem>>, %arg5: memref<8x4xf32, #tpu.memory_space<vmem>>) attributes {dimension_semantics = [#tpu.dimension_semantics<parallel>], iteration_bounds = array<i64: 1>, scalar_prefetch = 0 : i64, scratch_operands = 0 : i64, tpu.core_type = #tpu.core_type<tc>, window_params = [{transform_indices = @transform_0, window_bounds = array<i64: 8, 8>}, {pipeline_mode = #tpu.pipeline_mode<synchronous>, transform_indices = @transform_1, window_bounds = array<i64: 8, 16>}, {pipeline_mode = #tpu.pipeline_mode<synchronous>, transform_indices = @transform_2, window_bounds = array<i64: 16, 4>}, {transform_indices = @transform_3, window_bounds = array<i64: 8, 16>}, {transform_indices = @transform_4, window_bounds = array<i64: 8, 4>}]} {
    %c0 = arith.constant 0 : index
    %c0_0 = arith.constant 0 : index
    %0 = vector.load %arg1[%c0, %c0_0] : memref<8x8xbf16, #tpu.memory_space<vmem>>, vector<8x8xbf16>
    %c0_1 = arith.constant 0 : index
    %c0_2 = arith.constant 0 : index
    %1 = vector.load %arg2[%c0_1, %c0_2] : memref<8x16xbf16, #tpu.memory_space<vmem>>, vector<8x16xbf16>
    %cst = arith.constant dense<0.000000e+00> : vector<8x16xf32>
    %2 = tpu.matmul %0, %1, %cst {dimension_numbers = #tpu.dot_dimension_numbers<[1], [0], [0], [1], [0, 0, 1, 1], [], []>} : vector<8x8xbf16>, vector<8x16xbf16>, vector<8x16xf32> -> vector<8x16xf32>
    %3 = arith.truncf %2 : vector<8x16xf32> to vector<8x16xbf16>
    %c0_3 = arith.constant 0 : index
    %c0_4 = arith.constant 0 : index
    %4 = vector.load %arg4[%c0_3, %c0_4] : memref<8x16xbf16, #tpu.memory_space<vmem>>, vector<8x16xbf16>
    tpu.vector_store %arg4[%c0_3, %c0_4], %3 {strides = array<i32>} : memref<8x16xbf16, #tpu.memory_space<vmem>>, vector<8x16xbf16>,
    %c0_5 = arith.constant 0 : index
    %c0_6 = arith.constant 0 : index
    %5 = vector.load %arg3[%c0_5, %c0_6] : memref<16x4xbf16, #tpu.memory_space<vmem>>, vector<16x4xbf16>
    %cst_7 = arith.constant dense<0.000000e+00> : vector<8x4xf32>
    %6 = tpu.matmul %3, %5, %cst_7 {dimension_numbers = #tpu.dot_dimension_numbers<[1], [0], [0], [1], [0, 0, 1, 1], [], []>} : vector<8x16xbf16>, vector<16x4xbf16>, vector<8x4xf32> -> vector<8x4xf32>
    %c0_8 = arith.constant 0 : index
    %c0_9 = arith.constant 0 : index
    %7 = vector.load %arg5[%c0_8, %c0_9] : memref<8x4xf32, #tpu.memory_space<vmem>>, vector<8x4xf32>
    tpu.vector_store %arg5[%c0_8, %c0_9], %6 {strides = array<i32>} : memref<8x4xf32, #tpu.memory_space<vmem>>, vector<8x4xf32>,
    return
  }
  func.func @transform_0(%arg0: i32) -> (i32, i32) {
    %c0_i32 = arith.constant 0 : i32
    %c0_i32_0 = arith.constant 0 : i32
    return %arg0, %c0_i32 : i32, i32
  }
  func.func @transform_1(%arg0: i32) -> (i32, i32) {
    %c0_i32 = arith.constant 0 : i32
    %c0_i32_0 = arith.constant 0 : i32
    %c0_i32_1 = arith.constant 0 : i32
    return %c0_i32, %c0_i32_0 : i32, i32
  }
  func.func @transform_2(%arg0: i32) -> (i32, i32) {
    %c0_i32 = arith.constant 0 : i32
    %c0_i32_0 = arith.constant 0 : i32
    %c0_i32_1 = arith.constant 0 : i32
    return %c0_i32, %c0_i32_0 : i32, i32
  }
  func.func @transform_3(%arg0: i32) -> (i32, i32) {
    %c0_i32 = arith.constant 0 : i32
    %c0_i32_0 = arith.constant 0 : i32
    return %arg0, %c0_i32 : i32, i32
  }
  func.func @transform_4(%arg0: i32) -> (i32, i32) {
    %c0_i32 = arith.constant 0 : i32
    %c0_i32_0 = arith.constant 0 : i32
    return %arg0, %c0_i32 : i32, i32
  }
}

</mosaic_0001>

<bundles_post_ra>
// kernel: tpu_custom_call.1
= control target key start
LH: loop header
LB: loop body
LE: loop exit
PB: predicated region body
PF: predicated region fallthrough
CT: control target
= control target key end

     0   :  { %vm24_vm0 = vcmask 1043456   ;;  %v190_v1 = vmov 0.0   ;;  %vm191_vm1 = vmmov 0   ;;  %vm20_vm2 = vcmask 64512   ;;  %s242_s0 = inlined_call_operand.vmem [shape: bf16[8,8], index: 0, kind: input, shape index: {}]   ;;  %s243_s1 = inlined_call_operand.vmem [shape: bf16[8,16], index: 1, kind: input, shape index: {}]   ;;  %s244_s2 = inlined_call_operand.vmem [shape: bf16[16,4], index: 2, kind: input, shape index: {}]   ;;  %s245_s3 = inlined_call_operand.hbm [shape: bf16[8,16], index: 3, kind: output, shape index: {0}]   ;;  %s246_s4 = inlined_call_operand.vmem [shape: f32[8,4], index: 4, kind: output, shape index: {1}]  }
   0x1   :  { %v19_v0 = vld [vmem:[%s243_s1] sm:$0xf]  ;;  %150 = vmatprep.subr.bf16.mxu0 %v190_v1  ;;  %152 = vmatprep.mubr.msk.bf16.mxu0 %vm191_vm1, %v190_v1 }
   0x2   :  { %v26_v2 = vsel %vm24_vm0, %v19_v0, 0  ;;  %v18_v3 = vld [vmem:[%s242_s0] sm:$0xf]  ;;  %156 = vmatprep.subr.bf16.mxu1 %v190_v1 }
   0x3   :  { %151 = vmatpush3.bf16.msra.mxu0 %v26_v2 }
   0x4   :  { %10 = vsyncpa [#allocation3], 0  ;;  %158 = vmatprep.mubr.msk.bf16.mxu1 %vm191_vm1, %v190_v1  ;;  %v165_v4 = vld [vmem:[%s244_s2] sm:$0xff]   ;;  %vm79_vm3 = vcmask 130048   ;;  %vm69_vm4 = vcmask 125952   ;;  %s192_s1 = smov [#allocation2]  }
   0x5   :  { %157 = vmatpush3.bf16.msra.mxu1 %v165_v4  ;;  %s131_s0 = sshll.u32 %s192_s1, 4  ;;  %s132_s0 = int_to_ptr.vmem [resolvable:$true] %s131_s0 }
   0x6   :  { %153 = vmatmul.mubr.msk.bf16.vlgmr.msra.gmra.mrb[0].mxu0 %vm20_vm2, %v18_v3  ;;  %s166_s21 = scalar_lea.vmem %s132_s0, 64  ;;  %p171_p1 = scmp.lt.s32.totalorder %s132_s0, %s132_s0 }
   0x7   :  { %p167_p0 = scmp.ne.s32.totalorder %s132_s0, %s166_s21  ;;  %p172_p2 = scmp.lt.s32.totalorder %s166_s21, %s166_s21 }
   0x9   :  { %p173_p3 = por %p172_p2, %p171_p1 }
   0xb   :  { %p174_p4 = pnand %p173_p3, %p167_p0 }
  0xd9   :  { %v62_v5 = vpop.f32.mrb[0].mxu0 }
  0xda   :  { %v68_v6 = vpack.c.bf16 %v62_v5, %v62_v5  ;;  %v154_v7 = vpop.f32.mrb[1].mxu0 }
  0xdb   :  { %v65_v8 = vpop.f32.mrb[2].mxu0 }
  0xdc   :  { %v155_v9 = vpop.f32.mrb[3].mxu0  ;;  %159 = vmatmul.mubr.msk.bf16.vlgmr.msra.gmra.mrb[0].mxu1 %vm79_vm3, %v68_v6  ;;  %70 = vst.msk [vmem:[#allocation2] sm:$0xf] %vm69_vm4, %v68_v6 }
  0xdd   :  { %177 = shalt.err (!%p174_p4)
}
  0xde   :  { %s178_s23 = scalar_lea.hbm %s245_s3, 64 }
  0xdf   :  { %p179_p5 = scmp.ne.s32.totalorder %s245_s3, %s178_s23  ;;  %p182_p6 = scmp.lt.u32.totalorder %s178_s23, %s245_s3 }
  0xe1   :  { %p184_p7 = pnand %p182_p6, %p179_p5 }
  0xe3   :  { %187 = shalt.err (!%p184_p7)
}
  0xe4   :  { %134 = dma.vmem_to_hbm [thread:$0]  %s132_s0, 64, %s245_s3, [#allocation3]   ;;  %vm123_vm5 = vcmask 31744  }
 0x1af   :  { %v117_v10 = vpop.f32.mrb[0].mxu1 }
 0x1b0   :  { %124 = vst.msk [vmem:[%s246_s4] sm:$0xff] %vm123_vm5, %v117_v10  ;;  %v160_v11 = vpop.f32.mrb[1].mxu1 }
 0x1b1   :  { %v120_v12 = vpop.f32.mrb[2].mxu1 }
 0x1b2   :  { %v161_v13 = vpop.f32.mrb[3].mxu1 }
 0x1b3   :  { %188 = dma.done.wait [#allocation3], 64  }
 0x1b4   :  { %189 = vsyncadd [#allocation3], 4294967232 }
 0x1b5   :  { %142 = vsyncpa [#allocation3], 1 }

</bundles_post_ra>
